<compile_context>
chip_gen: v7x
topology: tpu7x:2x2x1
jax: 0.10.0
libtpu: 0.0.40
codegen_flags: <defaults>
</compile_context>

<pallas_src>
import math

import numpy as np
import jax
import jax.numpy as jnp
from jax.experimental import pallas as pl
from jax.experimental.pallas import tpu as pltpu

LANE = 128
SUBLANE = 8
VMEM_LIMIT = 48 * 1024 * 1024   # > all scoped defaults, < v7x 64 MiB physical


def _round_up(v, m):
    return ((v + m - 1) // m) * m


def _choose_prop_tiles(n_pad):
    """Streaming-regime tiles for the HBM-bound A matvec.

    tm: <= 512 and chosen so n_pad // tm >= 2 whenever possible, so the
        'parallel' row axis can shard across v7x's two TensorCores.
    tk: as large as possible (up to 2048); the kernel is HBM-bound on A and a
        512x2048 bf16 tile (2 MiB, 4 MiB double-buffered) fits every
        generation's scoped VMEM, so bigger tiles just amortize the ~0.35 us
        per-grid-step overhead.
    """
    tm = 128
    for c in (512, 256, 128):
        if n_pad % c == 0 and n_pad // c >= 2:
            tm = c
            break
    tk = 128
    for c in (2048, 1024, 512, 256, 128):
        if n_pad % c == 0:
            tk = c
            break
    return tm, tk


def _choose_pool_tile(n_pad, enc_pad, g_pad):
    """Reduction tile for the pool/head kernel.

    With g_pad ~ 8 the MXU is mostly idle anyway, so the kernel is pure
    overhead: collapse to a single grid step whenever the bf16 node_emb and
    pool streams (x2 for double buffering) fit well inside scoped VMEM;
    otherwise use large (>=2048) reduction tiles.
    """
    bytes_per_row = (enc_pad + g_pad) * 2            # bf16 node row + pool col
    if 2 * n_pad * bytes_per_row <= 12 * 1024 * 1024:
        return n_pad
    for c in (8192, 4096, 2048, 1024, 512, 256, 128):
        if n_pad % c == 0:
            return c
    return 128


# --------------------- kernel 1: GCN propagation (tiled) --------------------- #
def prop_kernel(a_ref, x_ref, wenc_ref, benc_ref, node_ref, acc_ref):
    """node_tile = ReLU((A_row_tile @ x) * w_enc + b_enc).

    Rank-1 encoder lift: A @ (x * w_enc) == (A @ x) * w_enc, so only a matvec
    hits the MXU; the [tm,1]x[1,ENC] broadcast happens once per row tile
    (finalize step), never per reduction step.  A stays bf16 end-to-end
    (entries of A+I are small integers -> exact); x is VMEM-resident and the
    tiny (tk,1) slice is cast to bf16 so both MXU operands are bf16 with f32
    accumulation.
    """
    k = pl.program_id(1)
    tk = a_ref.shape[1]

    @pl.when(k == 0)
    def _init():
        acc_ref[...] = jnp.zeros_like(acc_ref)

    start = pl.multiple_of(k * tk, tk)
    x_blk = x_ref[pl.ds(start, tk), :].astype(jnp.bfloat16)          # [tk, 1]
    acc_ref[...] += jnp.dot(a_ref[...], x_blk,
                            preferred_element_type=jnp.float32)      # [tm, 1] f32

    @pl.when(k == pl.num_programs(1) - 1)
    def _finalize():
        node = acc_ref[...] * wenc_ref[...] + benc_ref[...]          # [tm, ENC_PAD]
        node_ref[...] = jnp.maximum(node, 0.0).astype(node_ref.dtype)


# ---------------- kernel 2: mean pool + projection head (tiled) -------------- #
def pool_head_kernel(p_ref, node_ref, w1_ref, b1_ref, w2_ref, b2_ref,
                     z_ref, acc_ref):
    k = pl.program_id(0)

    @pl.when(k == 0)
    def _init():
        acc_ref[...] = jnp.zeros_like(acc_ref)

    # z partial: bf16 [G_PAD, tk] @ bf16 [tk, ENC_PAD], f32 accumulation.
    acc_ref[...] += jnp.dot(p_ref[...], node_ref[...],
                            preferred_element_type=jnp.float32)

    @pl.when(k == pl.num_programs(0) - 1)
    def _finalize():
        z = acc_ref[...]
        h = jnp.dot(z, w1_ref[...], preferred_element_type=jnp.float32) + b1_ref[...]
        h = jnp.maximum(h, 0.0)
        z_ref[...] = jnp.dot(h, w2_ref[...], preferred_element_type=jnp.float32) + b2_ref[...]


# ------------------------------ pallas wrapper ------------------------------- #
def transfer_model_forward(a_pad, x, pool_pad, params, n_nodes, n_graphs):
    """GCN propagation + mean pool + projection head via two Pallas calls.

    a_pad:    (n_pad, n_pad) bf16, already padded (A + I).
    x:        (n_nodes, 1)   f32 node scalar features.
    pool_pad: (g_pad, n_pad) bf16 mean-pool matrix, already padded.
    """
    n_pad = a_pad.shape[0]
    g_pad = pool_pad.shape[0]
    enc_dim = params["w_enc"].shape[1]
    proj_dim = params["w1"].shape[1]
    out_dim = params["w2"].shape[1]

    # Lane-dense padding (unmasked vst / full MXU columns); zero padding is exact
    # here because b_enc == 0 (padded node rows stay zero) and pool's padded
    # columns are zero.
    enc_pad = _round_up(enc_dim, LANE)
    proj_pad = _round_up(proj_dim, LANE)
    out_pad = _round_up(out_dim, LANE)

    f32 = jnp.float32
    bf16 = jnp.bfloat16
    x_p = jnp.zeros((n_pad, 1), f32).at[:n_nodes, :].set(x.astype(f32))
    wenc_p = jnp.zeros((1, enc_pad), f32).at[:, :enc_dim].set(params["w_enc"])
    benc_p = jnp.zeros((1, enc_pad), f32).at[:, :enc_dim].set(params["b_enc"])
    w1_p = jnp.zeros((enc_pad, proj_pad), f32).at[:enc_dim, :proj_dim].set(params["w1"])
    b1_p = jnp.zeros((1, proj_pad), f32).at[:, :proj_dim].set(params["b1"])
    w2_p = jnp.zeros((proj_pad, out_pad), f32).at[:proj_dim, :out_dim].set(params["w2"])
    b2_p = jnp.zeros((1, out_pad), f32).at[:, :out_dim].set(params["b2"])

    tm, tk = _choose_prop_tiles(n_pad)

    # ---- propagation: tiled over (node-row tiles [parallel], contraction [arbitrary]) ----
    node_emb = pl.pallas_call(
        prop_kernel,
        out_shape=jax.ShapeDtypeStruct((n_pad, enc_pad), bf16),
        grid_spec=pltpu.PrefetchScalarGridSpec(
            num_scalar_prefetch=0,
            grid=(n_pad // tm, n_pad // tk),
            in_specs=[
                pl.BlockSpec((tm, tk), lambda i, k: (i, k)),       # A_hat (bf16)
                pl.BlockSpec((n_pad, 1), lambda i, k: (0, 0)),     # x, VMEM-resident
                pl.BlockSpec((1, enc_pad), lambda i, k: (0, 0)),   # w_enc
                pl.BlockSpec((1, enc_pad), lambda i, k: (0, 0)),   # b_enc
            ],
            out_specs=pl.BlockSpec((tm, enc_pad), lambda i, k: (i, 0)),
            scratch_shapes=[pltpu.VMEM((tm, 1), f32)],
        ),
        compiler_params=pltpu.CompilerParams(
            dimension_semantics=("parallel", "arbitrary"),
            vmem_limit_bytes=VMEM_LIMIT,
        ),
        cost_estimate=pl.CostEstimate(
            flops=2 * n_pad * n_pad + 2 * n_pad * enc_pad,
            transcendentals=0,
            bytes_accessed=n_pad * n_pad * 2 + n_pad * 4
            + 2 * enc_pad * 4 + n_pad * enc_pad * 2,
        ),
    )(a_pad, x_p, wenc_p, benc_p)

    # ---- mean pool + projection head: single step when it fits, else big tiles ----
    tkp = _choose_pool_tile(n_pad, enc_pad, g_pad)
    z_full = pl.pallas_call(
        pool_head_kernel,
        out_shape=jax.ShapeDtypeStruct((g_pad, out_pad), f32),
        grid_spec=pltpu.PrefetchScalarGridSpec(
            num_scalar_prefetch=0,
            grid=(n_pad // tkp,),
            in_specs=[
                pl.BlockSpec((g_pad, tkp), lambda k: (0, k)),        # pool (bf16)
                pl.BlockSpec((tkp, enc_pad), lambda k: (k, 0)),      # node_emb (bf16)
                pl.BlockSpec((enc_pad, proj_pad), lambda k: (0, 0)),
                pl.BlockSpec((1, proj_pad), lambda k: (0, 0)),
                pl.BlockSpec((proj_pad, out_pad), lambda k: (0, 0)),
                pl.BlockSpec((1, out_pad), lambda k: (0, 0)),
            ],
            out_specs=pl.BlockSpec((g_pad, out_pad), lambda k: (0, 0)),
            scratch_shapes=[pltpu.VMEM((g_pad, enc_pad), f32)],
        ),
        compiler_params=pltpu.CompilerParams(
            dimension_semantics=("arbitrary",),
            vmem_limit_bytes=VMEM_LIMIT,
        ),
        cost_estimate=pl.CostEstimate(
            flops=2 * g_pad * n_pad * enc_pad
            + 2 * g_pad * enc_pad * proj_pad
            + 2 * g_pad * proj_pad * out_pad,
            transcendentals=0,
            bytes_accessed=g_pad * n_pad * 2 + n_pad * enc_pad * 2
            + enc_pad * proj_pad * 4 + proj_pad * out_pad * 4
            + g_pad * out_pad * 4,
        ),
    )(pool_pad, node_emb, w1_p, b1_p, w2_p, b2_p)

    # Slice padding back off (padding is exact zeros -> no semantic change);
    # return node_emb in f32 for API parity with the PyTorch module.
    return z_full[:n_graphs, :out_dim], node_emb[:n_nodes, :enc_dim].astype(f32)


# ------------------------------- glue / init --------------------------------- #
def xavier_uniform(key, shape):
    fan_in, fan_out = shape
    limit = math.sqrt(6.0 / (fan_in + fan_out))
    return jax.random.uniform(key, shape, jnp.float32, -limit, limit)


def make_params(key, enc_dim, proj_hidden_dim, output_dim):
    k0, k1, k2 = jax.random.split(key, 3)
    return {
        "w_enc": xavier_uniform(k0, (1, enc_dim)),
        "b_enc": jnp.zeros((1, enc_dim), jnp.float32),
        # module's Linear layers: xavier_uniform weights, zero bias
        "w1": xavier_uniform(k1, (enc_dim, proj_hidden_dim)),
        "b1": jnp.zeros((1, proj_hidden_dim), jnp.float32),
        "w2": xavier_uniform(k2, (proj_hidden_dim, output_dim)),
        "b2": jnp.zeros((1, output_dim), jnp.float32),
    }


def dense_adjacency_padded(edge_index, edge_weight, n_nodes, n_pad):
    """A_hat = A + I scattered directly into the padded bf16 buffer.

    When edge_weight is None, entries of A+I are small integers -> exact in
    bf16 and a single bf16 scatter-add builds the padded buffer with no f32
    intermediate.  With explicit float weights we scatter-accumulate in f32
    first and cast once (bf16 keeps ~3 decimal digits; kernel tolerance 5e-2).
    Assumes edge_index lists each undirected edge once (both-direction lists
    would double-count weights).  NOT degree-normalized (stand-in encoder).
    TODO(synk): for large sparse graphs replace the dense A_hat with a
    scalar-prefetched neighbor gather.
    """
    src, dst = edge_index
    diag = jnp.arange(n_nodes, dtype=src.dtype)
    rows = jnp.concatenate([src, dst, diag])
    cols = jnp.concatenate([dst, src, diag])
    if edge_weight is None:
        vals = jnp.ones((rows.shape[0],), jnp.bfloat16)
        return jnp.zeros((n_pad, n_pad), jnp.bfloat16).at[rows, cols].add(vals)
    w = edge_weight.astype(jnp.float32)
    vals = jnp.concatenate([w, w, jnp.ones((n_nodes,), jnp.float32)])
    a_f32 = jnp.zeros((n_pad, n_pad), jnp.float32).at[rows, cols].add(vals)
    return a_f32.astype(jnp.bfloat16)


def mean_pool_matrix_padded(batch, n_graphs, n_nodes, g_pad, n_pad):
    """bf16 mean-pool matrix, built straight into the padded buffer."""
    onehot = (batch[None, :] == jnp.arange(n_graphs)[:, None]).astype(jnp.float32)
    counts = jnp.maximum(onehot.sum(axis=1, keepdims=True), 1.0)
    p = (onehot / counts).astype(jnp.bfloat16)                       # [G, N]
    return jnp.zeros((g_pad, n_pad), jnp.bfloat16).at[:n_graphs, :n_nodes].set(p)


def transfer_model(batch, x, edge_index, edge_attr, edge_weight=None,
                   *, params, n_graphs, features=False):
    # --- forward() preprocessing semantics from the PyTorch module ---
    if not features:
        x = jnp.ones_like(x)
    if x.shape[1] > 1:
        x = x[:, 0].reshape(-1, 1)
    if edge_attr.shape[1] > 1:
        edge_attr = edge_attr[:, 0].reshape(-1, 1)
    # TODO(synk): the synthetic stand-in encoder ignores edge_attr (the real
    # encoder is injected externally and its use of edge_attr is unspecified).

    n_nodes = x.shape[0]
    n_pad = _round_up(max(n_nodes, LANE), LANE)
    g_pad = _round_up(max(n_graphs, SUBLANE), SUBLANE)

    a_pad = dense_adjacency_padded(edge_index, edge_weight, n_nodes, n_pad)
    pool_pad = mean_pool_matrix_padded(batch, n_graphs, n_nodes, g_pad, n_pad)
    return transfer_model_forward(a_pad, x.astype(jnp.float32), pool_pad,
                                  params, n_nodes, n_graphs)


# --------------------------- numpy reference check ---------------------------- #
def reference_forward(a_hat, x, pool, params):
    a = np.asarray(a_hat, np.float64)
    xx = np.asarray(x, np.float64)
    p = np.asarray(pool, np.float64)
    h0 = xx * np.asarray(params["w_enc"], np.float64)
    node = np.maximum(a @ h0 + np.asarray(params["b_enc"], np.float64), 0.0)
    z = p @ node
    h = np.maximum(z @ np.asarray(params["w1"], np.float64)
                   + np.asarray(params["b1"], np.float64), 0.0)
    z = h @ np.asarray(params["w2"], np.float64) + np.asarray(params["b2"], np.float64)
    return z, node


# ---------------------------------- main -------------------------------------- #
if __name__ == "__main__":
    ENC_DIM = 16          # encoder.out_graph_dim
    PROJ_HIDDEN = 32      # proj_hidden_dim (module default 300, shrunk)
    OUTPUT_DIM = 32       # output_dim      (module default 300, shrunk)
    N_NODES = 256         # 2 ring graphs of 128 nodes -> propagation grid (2, 1)
    N_GRAPHS = 2
    NODES_PER_GRAPH = N_NODES // N_GRAPHS

    key = jax.random.PRNGKey(0)
    k_params, k_x, k_ea = jax.random.split(key, 3)
    params = make_params(k_params, ENC_DIM, PROJ_HIDDEN, OUTPUT_DIM)

    # two ring graphs
    batch = jnp.repeat(jnp.arange(N_GRAPHS, dtype=jnp.int32), NODES_PER_GRAPH)
    src = jnp.arange(N_NODES, dtype=jnp.int32)
    g = src // NODES_PER_GRAPH
    dst = g * NODES_PER_GRAPH + ((src % NODES_PER_GRAPH) + 1) % NODES_PER_GRAPH
    edge_index = jnp.stack([src, dst.astype(jnp.int32)])             # [2, E]

    x = jax.random.normal(k_x, (N_NODES, 4), jnp.float32)            # multi-dim feats
    edge_attr = jax.random.normal(k_ea, (N_NODES, 3), jnp.float32)   # multi-dim attrs

    z, node_emb = transfer_model(batch, x, edge_index, edge_attr, None,
                                 params=params, n_graphs=N_GRAPHS, features=False)
    jax.block_until_ready((z, node_emb))

    assert z.shape == (N_GRAPHS, OUTPUT_DIM)
    assert node_emb.shape == (N_NODES, ENC_DIM)

    # numerical sanity check against float64 numpy reference
    x_pre = jnp.ones_like(x)[:, 0].reshape(-1, 1)
    n_pad = _round_up(max(N_NODES, LANE), LANE)
    a_ref = np.asarray(
        dense_adjacency_padded(edge_index, None, N_NODES, n_pad),
        np.float64)[:N_NODES, :N_NODES]
    p_ref = (np.asarray(batch)[None, :] == np.arange(N_GRAPHS)[:, None]).astype(np.float64)
    p_ref = p_ref / p_ref.sum(axis=1, keepdims=True)
    z_ref, node_ref = reference_forward(a_ref, x_pre, p_ref, params)
    np.testing.assert_allclose(np.asarray(z), z_ref, rtol=5e-2, atol=5e-2)
    np.testing.assert_allclose(np.asarray(node_emb), node_ref, rtol=5e-2, atol=5e-2)

    print("KERNEL_OK")
</pallas_src>

<mosaic_0001>
module attributes {stable_mosaic.version = 11 : i64} {
  func.func @prop_kernel(%arg0: i32, %arg1: i32, %arg2: memref<128x256xbf16, #tpu.memory_space<vmem>>, %arg3: memref<256x1xf32, #tpu.memory_space<vmem>>, %arg4: memref<1x128xf32, #tpu.memory_space<vmem>>, %arg5: memref<1x128xf32, #tpu.memory_space<vmem>>, %arg6: memref<128x128xbf16, #tpu.memory_space<vmem>>, %arg7: memref<128x1xf32, #tpu.memory_space<vmem>>) attributes {dimension_semantics = [#tpu.dimension_semantics<parallel>, #tpu.dimension_semantics<arbitrary>], iteration_bounds = array<i64: 2, 1>, scalar_prefetch = 0 : i64, scratch_operands = 1 : i64, tpu.core_type = #tpu.core_type<tc>, window_params = [{transform_indices = @transform_0, window_bounds = array<i64: 128, 256>}, {pipeline_mode = #tpu.pipeline_mode<synchronous>, transform_indices = @transform_1, window_bounds = array<i64: 256, 1>}, {pipeline_mode = #tpu.pipeline_mode<synchronous>, transform_indices = @transform_2, window_bounds = array<i64: 1, 128>}, {pipeline_mode = #tpu.pipeline_mode<synchronous>, transform_indices = @transform_3, window_bounds = array<i64: 1, 128>}, {transform_indices = @transform_4, window_bounds = array<i64: 128, 128>}]} {
    %c0_i32 = arith.constant 0 : i32
    %0 = arith.cmpi eq, %arg1, %c0_i32 : i32
    %1 = arith.extui %0 : i1 to i32
    %c0_i32_0 = arith.constant 0 : i32
    %2 = arith.cmpi ne, %1, %c0_i32_0 : i32
    scf.if %2 {
      %cst_9 = arith.constant 0.000000e+00 : f32
      %16 = vector.broadcast %cst_9 : f32 to vector<128x1xf32>
      %c0_10 = arith.constant 0 : index
      %c0_11 = arith.constant 0 : index
      %17 = vector.load %arg7[%c0_10, %c0_11] : memref<128x1xf32, #tpu.memory_space<vmem>>, vector<128x1xf32>
      tpu.vector_store %arg7[%c0_10, %c0_11], %16 {strides = array<i32>} : memref<128x1xf32, #tpu.memory_space<vmem>>, vector<128x1xf32>,
    } else {
    }
    %c256_i32 = arith.constant 256 : i32
    %3 = arith.muli %arg1, %c256_i32 : i32
    %4 = tpu.assume_multiple %3, 256 : i32
    %5 = arith.index_cast %4 : i32 to index
    %c0 = arith.constant 0 : index
    %6 = vector.load %arg3[%5, %c0] : memref<256x1xf32, #tpu.memory_space<vmem>>, vector<256x1xf32>
    %7 = arith.truncf %6 : vector<256x1xf32> to vector<256x1xbf16>
    %c0_1 = arith.constant 0 : index
    %c0_2 = arith.constant 0 : index
    %8 = vector.load %arg7[%c0_1, %c0_2] : memref<128x1xf32, #tpu.memory_space<vmem>>, vector<128x1xf32>
    %c0_3 = arith.constant 0 : index
    %c0_4 = arith.constant 0 : index
    %9 = vector.load %arg2[%c0_3, %c0_4] : memref<128x256xbf16, #tpu.memory_space<vmem>>, vector<128x256xbf16>
    %cst = arith.constant dense<0.000000e+00> : vector<128x1xf32>
    %10 = tpu.matmul %9, %7, %cst {dimension_numbers = #tpu.dot_dimension_numbers<[1], [0], [0], [1], [0, 0, 1, 1], [], []>} : vector<128x256xbf16>, vector<256x1xbf16>, vector<128x1xf32> -> vector<128x1xf32>
    %11 = arith.addf %8, %10 : vector<128x1xf32>
    %c0_5 = arith.constant 0 : index
    %c0_6 = arith.constant 0 : index
    %12 = vector.load %arg7[%c0_5, %c0_6] : memref<128x1xf32, #tpu.memory_space<vmem>>, vector<128x1xf32>
    tpu.vector_store %arg7[%c0_5, %c0_6], %11 {strides = array<i32>} : memref<128x1xf32, #tpu.memory_space<vmem>>, vector<128x1xf32>,
    %c0_i32_7 = arith.constant 0 : i32
    %13 = arith.cmpi eq, %arg1, %c0_i32_7 : i32
    %14 = arith.extui %13 : i1 to i32
    %c0_i32_8 = arith.constant 0 : i32
    %15 = arith.cmpi ne, %14, %c0_i32_8 : i32
    scf.if %15 {
      %c0_9 = arith.constant 0 : index
      %c0_10 = arith.constant 0 : index
      %16 = vector.load %arg7[%c0_9, %c0_10] : memref<128x1xf32, #tpu.memory_space<vmem>>, vector<128x1xf32>
      %c0_11 = arith.constant 0 : index
      %c0_12 = arith.constant 0 : index
      %17 = vector.load %arg4[%c0_11, %c0_12] : memref<1x128xf32, #tpu.memory_space<vmem>>, vector<1x128xf32>
      %18 = vector.broadcast %16 : vector<128x1xf32> to vector<128x128xf32>
      %19 = vector.broadcast %17 : vector<1x128xf32> to vector<128x128xf32>
      %20 = arith.mulf %18, %19 : vector<128x128xf32>
      %c0_13 = arith.constant 0 : index
      %c0_14 = arith.constant 0 : index
      %21 = vector.load %arg5[%c0_13, %c0_14] : memref<1x128xf32, #tpu.memory_space<vmem>>, vector<1x128xf32>
      %22 = vector.broadcast %21 : vector<1x128xf32> to vector<128x128xf32>
      %23 = arith.addf %20, %22 : vector<128x128xf32>
      %cst_15 = arith.constant 0.000000e+00 : f32
      %24 = vector.broadcast %cst_15 : f32 to vector<128x128xf32>
      %25 = arith.maximumf %23, %24 : vector<128x128xf32>
      %26 = arith.truncf %25 : vector<128x128xf32> to vector<128x128xbf16>
      %c0_16 = arith.constant 0 : index
      %c0_17 = arith.constant 0 : index
      %27 = vector.load %arg6[%c0_16, %c0_17] : memref<128x128xbf16, #tpu.memory_space<vmem>>, vector<128x128xbf16>
      tpu.vector_store %arg6[%c0_16, %c0_17], %26 {strides = array<i32>} : memref<128x128xbf16, #tpu.memory_space<vmem>>, vector<128x128xbf16>,
    } else {
    }
    return
  }
  func.func @transform_0(%arg0: i32, %arg1: i32) -> (i32, i32) {
    %c0_i32 = arith.constant 0 : i32
    return %arg0, %arg1 : i32, i32
  }
  func.func @transform_1(%arg0: i32, %arg1: i32) -> (i32, i32) {
    %c0_i32 = arith.constant 0 : i32
    %c0_i32_0 = arith.constant 0 : i32
    %c0_i32_1 = arith.constant 0 : i32
    return %c0_i32, %c0_i32_0 : i32, i32
  }
  func.func @transform_2(%arg0: i32, %arg1: i32) -> (i32, i32) {
    %c0_i32 = arith.constant 0 : i32
    %c0_i32_0 = arith.constant 0 : i32
    %c0_i32_1 = arith.constant 0 : i32
    return %c0_i32, %c0_i32_0 : i32, i32
  }
  func.func @transform_3(%arg0: i32, %arg1: i32) -> (i32, i32) {
    %c0_i32 = arith.constant 0 : i32
    %c0_i32_0 = arith.constant 0 : i32
    %c0_i32_1 = arith.constant 0 : i32
    return %c0_i32, %c0_i32_0 : i32, i32
  }
  func.func @transform_4(%arg0: i32, %arg1: i32) -> (i32, i32) {
    %c0_i32 = arith.constant 0 : i32
    %c0_i32_0 = arith.constant 0 : i32
    return %arg0, %c0_i32 : i32, i32
  }
}

</mosaic_0001>

<bundles_post_ra>
// kernel: tpu_custom_call.1
= control target key start
LH: loop header
LB: loop body
LE: loop exit
PB: predicated region body
PF: predicated region fallthrough
CT: control target
= control target key end

     0   :  { %9 = vsyncpa [#allocation4], 0  ;;  %s1582_s0 = inlined_call_operand.vmem [shape: bf16[256,256], index: 0, kind: input, shape index: {}]   ;;  %s1583_s1 = inlined_call_operand.vmem [shape: f32[256,1], index: 1, kind: input, shape index: {}]   ;;  %s1584_s2 = inlined_call_operand.vmem [shape: f32[1,128], index: 2, kind: input, shape index: {}]   ;;  %s1585_s3 = inlined_call_operand.vmem [shape: f32[1,128], index: 3, kind: input, shape index: {}]   ;;  %s1586_s4 = inlined_call_operand.hbm [shape: bf16[256,128], index: 4, kind: output, shape index: {}]  }
   0x1   :  { %11 = vsyncpa [#allocation4 + $0x1], 0  ;;  %s1265_s15 = smov 0   ;;  %s1267_s16 = smov 0  }
   0x2   :  { %s1269_s17 = smov 0   ;;  %s1271_s18 = smov 0  }
   0x3   :  { %s1273_s19 = smov 0   ;;  %s1275_s20 = smov 0  }
   0x4 LB: > { %s877_s21 = sadd.s32 4294967295, %s1233_s20   ;;  %s878_s22 = sadd.s32 4294967294, %s1233_s20   ;;  %s1233_s20 = sphi %s1275_s20, %s17_s20   ;;  %s1229_s19 = sphi %s1273_s19, %s1593_s19   ;;  %s1225_s18 = sphi %s1271_s18, %s1592_s18   ;;  %s1221_s17 = sphi %s1269_s17, %s1591_s17   ;;  %s1217_s16 = sphi %s1267_s16, %s1590_s16   ;;  %s1213_s15 = sphi %s1265_s15, %s1589_s15  }
   0x5   : > { %s29_s23 = sadd.s32 1, %s1229_s19  ;;  %s127_s24 = sadd.s32 1, %s1221_s17 }
   0x6   : > { %p31_p0 = scmp.ge.s32.totalorder %s29_s23, 2  ;;  %p137_p1 = scmp.ne.s32.totalorder %s1221_s17, %s1217_s16 }
   0x7   : > { %p138_p2 = scmp.eq.s32.totalorder %s877_s21, 1  ;;  %p143_p3 = scmp.ne.s32.totalorder %s1217_s16, %s1213_s15 }
   0x8   : > { %s1595_s23 = smov (%p31_p0, %s29_s23), 0  ;;  %p144_p5 = scmp.eq.s32.totalorder %s878_s22, 1 }
   0x9   : > { %p1305_p4 = por %p138_p2, %p137_p1  ;;  %s124_s26 = ssub.s32 %s1229_s19, %s1595_s23 }
   0xa   : > { %p881_p6 = scmp.ge.s32.totalorder %s1233_s20, 1  ;;  %p125_p7 = scmp.eq.s32.totalorder %s124_s26, 0 }
   0xb   : > { %p1312_p8 = por %p144_p5, %p143_p3  ;;  %p186_p9 = scmp.lt.s32.totalorder %s1233_s20, 3 }
   0xc   : > { %s1318_s28 = scalar_select %p125_p7, %s1221_s17, %s127_s24  }
   0xd   : > { %p187_p10 = pnand %p881_p6, %p186_p9 }
   0xe   : > { %v270_v0 = vld [vmem:[%s1583_s1 + $0x80] sm:$0xff] (!%p187_p10)  ;;  %v271_v1 = vld [vmem:[%s1583_s1 + $0x88] sm:$0xff] (!%p187_p10)  ;;  %s883_s9 = sshll.u32 (!%p187_p10), %s1225_s18, 4  ;;  %v272_v5 = vld [vmem:[%s1583_s1 + $0x90] sm:$0xff] (!%p187_p10)  ;;  %vm235_vm0 = vcmask (!%p187_p10), 7168   ;;  %s214_s14 = sand.u32 (!%p187_p10), 1, %s1217_s16  }
   0xf   : > { %190 = sbr.rel (%p187_p10) target bundleno = 457 (0x1c9), region = 36  ;;  %v254_v2 = vld [vmem:[%s1583_s1] sm:$0xff] (!%p187_p10)  ;;  %v294_v3 = vpack.c.bf16 (!%p187_p10), %v271_v1, %v270_v0  ;;  %v255_v4 = vld [vmem:[%s1583_s1 + $0x8] sm:$0xff] (!%p187_p10)  ;;  %v273_v6 = vld [vmem:[%s1583_s1 + $0x98] sm:$0xff] (!%p187_p10)  ;;  %p219_p11 = scmp.lt.s32.totalorder (!%p187_p10), %s883_s9, 31  ;;  %v1235_v0 = vmov (!%p187_p10), 0.0  }
  0x10   : > { %v286_v7 = vpack.c.bf16 (!%p187_p10), %v255_v4, %v254_v2  ;;  %v295_v8 = vpack.c.bf16 (!%p187_p10), %v273_v6, %v272_v5  ;;  %v256_v9 = vld [vmem:[%s1583_s1 + $0x10] sm:$0xff] (!%p187_p10)  ;;  %v257_v10 = vld [vmem:[%s1583_s1 + $0x18] sm:$0xff] (!%p187_p10)  ;;  %v274_v11 = vld [vmem:[%s1583_s1 + $0xa0] sm:$0xff] (!%p187_p10)  ;;  %236 = vst.msk [vmem:[#allocation2] sm:$0xff] (!%p187_p10), %vm235_vm0, %v1235_v0  ;;  %v1236_v1 = vmov (!%p187_p10), 0   ;;  %s882_s21 = sshll.u32 (!%p187_p10), %s214_s14, 6 }
  0x11   : > { %990 = vmatprep.subr.bf16.mxu0 (!%p187_p10), %v294_v3  ;;  %1054 = vmatprep.subr.bf16.mxu1 (!%p187_p10), %v294_v3  ;;  %v275_v12 = vld [vmem:[%s1583_s1 + $0xa8] sm:$0xff] (!%p187_p10)  ;;  %v287_v13 = vpack.c.bf16 (!%p187_p10), %v257_v10, %v256_v9  ;;  %v258_v15 = vld [vmem:[%s1583_s1 + $0x20] sm:$0xff] (!%p187_p10)  ;;  %v276_v17 = vld [vmem:[%s1583_s1 + $0xb0] sm:$0xff] (!%p187_p10)  ;;  %237 = vst.msk [vmem:[#allocation2 + $0x8] sm:$0xff] (!%p187_p10), %vm235_vm0, %v1235_v0  ;;  %s1492_s22 = scalar_lea.vmem (!%p187_p10), [#allocation3], %s882_s21  ;;  %s942_s24 = sshll.u32 (!%p187_p10), %s1225_s18, 10 }
  0x12   : > { %991 = vmatpush3.bf16.msra.mxu0 (!%p187_p10), %v286_v7  ;;  %1062 = vmatpush3.bf16.msra.mxu1 (!%p187_p10), %v286_v7  ;;  %v296_v14 = vpack.c.bf16 (!%p187_p10), %v275_v12, %v274_v11  ;;  %v259_v16 = vld [vmem:[%s1583_s1 + $0x28] sm:$0xff] (!%p187_p10)  ;;  %v277_v18 = vld [vmem:[%s1583_s1 + $0xb8] sm:$0xff] (!%p187_p10)  ;;  %v260_v21 = vld [vmem:[%s1583_s1 + $0x30] sm:$0xff] (!%p187_p10)  ;;  %238 = vst.msk [vmem:[#allocation2 + $0x10] sm:$0xff] (!%p187_p10), %vm235_vm0, %v1235_v0  ;;  %s799_s26 = sshll.u32 (!%p187_p10), %s1492_s22, 4  ;;  %s1529_s5 = scalar_lea.hbm (!%p187_p10), %s1586_s4, %s942_s24  ;;  %s1531_s26 = int_to_ptr.vmem [resolvable:$true] %s799_s26 }
  0x13   : > { %992 = vmatprep.subr.bf16.mxu0 (!%p187_p10), %v295_v8  ;;  %1055 = vmatprep.subr.bf16.mxu1 (!%p187_p10), %v295_v8  ;;  %v288_v19 = vpack.c.bf16 (!%p187_p10), %v259_v16, %v258_v15  ;;  %v297_v20 = vpack.c.bf16 (!%p187_p10), %v277_v18, %v276_v17  ;;  %v261_v22 = vld [vmem:[%s1583_s1 + $0x38] sm:$0xff] (!%p187_p10)  ;;  %v278_v23 = vld [vmem:[%s1583_s1 + $0xc0] sm:$0xff] (!%p187_p10)  ;;  %v279_v24 = vld [vmem:[%s1583_s1 + $0xc8] sm:$0xff] (!%p187_p10)  ;;  %239 = vst.msk [vmem:[#allocation2 + $0x18] sm:$0xff] (!%p187_p10), %vm235_vm0, %v1235_v0  ;;  %s1536_s6 = scalar_lea.sflag (!%p187_p10), [#allocation4], %s214_s14  ;;  %s1155_s18 = scalar_lea.vmem (!%p187_p10), %s1531_s26, 1024 }
  0x14   : > { %v262_v25 = vld [vmem:[%s1583_s1 + $0x40] sm:$0xff] (!%p187_p10)  ;;  %v289_v27 = vpack.c.bf16 (!%p187_p10), %v261_v22, %v260_v21  ;;  %v263_v28 = vld [vmem:[%s1583_s1 + $0x48] sm:$0xff] (!%p187_p10)  ;;  %v298_v29 = vpack.c.bf16 (!%p187_p10), %v279_v24, %v278_v23  ;;  %v280_v31 = vld [vmem:[%s1583_s1 + $0xd0] sm:$0xff] (!%p187_p10)  ;;  %240 = vst.msk [vmem:[#allocation2 + $0x20] sm:$0xff] (!%p187_p10), %vm235_vm0, %v1235_v0  ;;  %1129 = vset.pattern.permute.xlu0 (!%p187_p10), %v1236_v1  ;;  %1130 = vset.pattern.permute.xlu1 (!%p187_p10), %v1236_v1  ;;  %p1156_p12 = scmp.ne.s32.totalorder (!%p187_p10), %s1531_s26, %s1155_s18  ;;  %s1237_s7 = smov (!%p187_p10), [#allocation3]  }
  0x15   : > { %v281_v32 = vld [vmem:[%s1583_s1 + $0xd8] sm:$0xff] (!%p187_p10)  ;;  %v290_v33 = vpack.c.bf16 (!%p187_p10), %v263_v28, %v262_v25  ;;  %v264_v34 = vld [vmem:[%s1583_s1 + $0x50] sm:$0xff] (!%p187_p10)  ;;  %v282_v37 = vld [vmem:[%s1583_s1 + $0xe0] sm:$0xff] (!%p187_p10)  ;;  %241 = vst.msk [vmem:[#allocation2 + $0x28] sm:$0xff] (!%p187_p10), %vm235_vm0, %v1235_v0  ;;  %s1159_s8 = sshll.u32 (!%p187_p10), %s1237_s7, 4  ;;  %s1160_s8 = int_to_ptr.vmem [resolvable:$false] %s1159_s8 }
  0x16   : > { %s1597_s9 = smov (!%p219_p11, %s883_s9), 31  ;;  %993 = vmatpush3.bf16.msra.mxu0 %v287_v13  ;;  %1063 = vmatpush3.bf16.msra.mxu1 %v287_v13  ;;  %v299_v35 = vpack.c.bf16 %v281_v32, %v280_v31  ;;  %v265_v36 = vld [vmem:[%s1583_s1 + $0x58] sm:$0xff]  ;;  %v283_v38 = vld [vmem:[%s1583_s1 + $0xe8] sm:$0xff]  ;;  %v266_v41 = vld [vmem:[%s1583_s1 + $0x60] sm:$0xff]  ;;  %242 = vst.msk [vmem:[#allocation2 + $0x30] sm:$0xff] %vm235_vm0, %v1235_v0  ;;  %p1157_p13 = pnand %p1156_p12, %p1305_p4 }
  0x17   : > { %s925_s13 = sshll.u32 %s1597_s9, 3  ;;  %994 = vmatprep.subr.bf16.mxu0 %v296_v14  ;;  %1056 = vmatprep.subr.bf16.mxu1 %v296_v14  ;;  %v291_v39 = vpack.c.bf16 %v265_v36, %v264_v34  ;;  %v300_v40 = vpack.c.bf16 %v283_v38, %v282_v37  ;;  %v267_v42 = vld [vmem:[%s1583_s1 + $0x68] sm:$0xff]  ;;  %v284_v43 = vld [vmem:[%s1583_s1 + $0xf0] sm:$0xff]  ;;  %v285_v44 = vld [vmem:[%s1583_s1 + $0xf8] sm:$0xff]  ;;  %243 = vst.msk [vmem:[#allocation2 + $0x38] sm:$0xff] %vm235_vm0, %v1235_v0  ;;  %s1161_s10 = scalar_lea.vmem %s1160_s8, 2048 }
  0x18   : > { %s1366_s30 = scalar_lea.vmem %s1582_s0, %s925_s13  ;;  %v292_v45 = vpack.c.bf16 %v267_v42, %v266_v41  ;;  %v301_v46 = vpack.c.bf16 %v285_v44, %v284_v43  ;;  %v268_v47 = vld [vmem:[%s1583_s1 + $0x70] sm:$0xff]  ;;  %v269_v48 = vld [vmem:[%s1583_s1 + $0x78] sm:$0xff]  ;;  %244 = vst.msk [vmem:[#allocation2 + $0x40] sm:$0xff] %vm235_vm0, %v1235_v0  ;;  %245 = vst.msk [vmem:[#allocation2 + $0x48] sm:$0xff] %vm235_vm0, %v1235_v0  ;;  %p1158_p0 = pneg %p1157_p13 }
  0x19   : > { %v1133_v26 = vld [vmem:[%s1366_s30 + $0x4] ss:$8 sps:$4 sm:$0xff]   ;;  %v293_v49 = vpack.c.bf16 %v269_v48, %v268_v47  ;;  %v1131_v50 = vld [vmem:[%s1366_s30] ss:$8 sps:$4 sm:$0xff]   ;;  %v1137_v52 = vld [vmem:[%s1366_s30 + $0x14] ss:$8 sps:$4 sm:$0xff]   ;;  %p1162_p1 = scmp.lt.s32.totalorder %s1531_s26, %s1160_s8  ;;  %p1163_p2 = scmp.lt.s32.totalorder %s1161_s10, %s1155_s18 }
  0x1a   : > { %995 = vmatpush3.bf16.msra.mxu0 %v288_v19  ;;  %1064 = vmatpush3.bf16.msra.mxu1 %v288_v19  ;;  %v1136_v30 = vld [vmem:[%s1366_s30 + $0x44] ss:$8 sps:$4 sm:$0xff]   ;;  %v1134_v51 = vld [vmem:[%s1366_s30 + $0x40] ss:$8 sps:$4 sm:$0xff]   ;;  %v1140_v53 = vld [vmem:[%s1366_s30 + $0x54] ss:$8 sps:$4 sm:$0xff]  }
  0x1b   : > { %996 = vmatprep.subr.bf16.mxu0 %v297_v20  ;;  %1057 = vmatprep.subr.bf16.mxu1 %v297_v20  ;;  %v1139_v54 = vld [vmem:[%s1366_s30 + $0x10] ss:$8 sps:$4 sm:$0xff]   ;;  %v1143_v56 = vld [vmem:[%s1366_s30 + $0x24] ss:$8 sps:$4 sm:$0xff]   ;;  %v1145_v58 = vld [vmem:[%s1366_s30 + $0x20] ss:$8 sps:$4 sm:$0xff]   ;;  %p1164_p3 = por %p1163_p2, %p1162_p1 }
  0x1c   : > { %446 = vmatprep.mubr.bf16.mxu0 %v1133_v26  ;;  %478 = vmatprep.mubr.bf16.mxu1 %v1136_v30  ;;  %v1142_v55 = vld [vmem:[%s1366_s30 + $0x50] ss:$8 sps:$4 sm:$0xff]   ;;  %v1146_v57 = vld [vmem:[%s1366_s30 + $0x64] ss:$8 sps:$4 sm:$0xff]   ;;  %v1148_v59 = vld [vmem:[%s1366_s30 + $0x60] ss:$8 sps:$4 sm:$0xff]  }
  0x1d   : > { %v1149_v60 = vld [vmem:[%s1366_s30 + $0x34] ss:$8 sps:$4 sm:$0xff]   ;;  %v1151_v62 = vld [vmem:[%s1366_s30 + $0x30] ss:$8 sps:$4 sm:$0xff]   ;;  %246 = vst.msk [vmem:[#allocation2 + $0x50] sm:$0xff] %vm235_vm0, %v1235_v0  ;;  %247 = vst.msk [vmem:[#allocation2 + $0x58] sm:$0xff] %vm235_vm0, %v1235_v0  ;;  %p1165_p5 = pnand %p1164_p3, %p1158_p0 }
  0x1e   : > { %997 = vmatpush3.bf16.msra.mxu0 %v289_v27  ;;  %1065 = vmatpush3.bf16.msra.mxu1 %v289_v27  ;;  %v1152_v61 = vld [vmem:[%s1366_s30 + $0x74] ss:$8 sps:$4 sm:$0xff]   ;;  %v1154_v63 = vld [vmem:[%s1366_s30 + $0x70] ss:$8 sps:$4 sm:$0xff]   ;;  %248 = vst.msk [vmem:[#allocation2 + $0x60] sm:$0xff] %vm235_vm0, %v1235_v0  ;;  %249 = vst.msk [vmem:[#allocation2 + $0x68] sm:$0xff] %vm235_vm0, %v1235_v0 }
  0x1f   : > { %998 = vmatprep.subr.bf16.mxu0 %v298_v29  ;;  %1058 = vmatprep.subr.bf16.mxu1 %v298_v29  ;;  %250 = vst.msk [vmem:[#allocation2 + $0x70] sm:$0xff] %vm235_vm0, %v1235_v0  ;;  %251 = vst.msk [vmem:[#allocation2 + $0x78] sm:$0xff] %vm235_vm0, %v1235_v0  ;;  %v302_v4 = vld [vmem:[#allocation2] sm:$0xff]  ;;  %v303_v12 = vld [vmem:[#allocation2 + $0x8] sm:$0xff] }
  0x20   : > { %v310_v6 = vld [vmem:[#allocation2 + $0x40] sm:$0xff]  ;;  %v311_v14 = vld [vmem:[#allocation2 + $0x48] sm:$0xff]  ;;  %v304_v24 = vld [vmem:[#allocation2 + $0x10] sm:$0xff] }
  0x21   : > { %v305_v32 = vld [vmem:[#allocation2 + $0x18] sm:$0xff] }
  0x22   : > { %999 = vmatpush3.bf16.msra.mxu0 %v290_v33  ;;  %1066 = vmatpush3.bf16.msra.mxu1 %v290_v33 }
  0x23   : > { %1000 = vmatprep.subr.bf16.mxu0 %v299_v35  ;;  %1059 = vmatprep.subr.bf16.mxu1 %v299_v35 }
  0x24   : > { %v312_v26 = vld [vmem:[#allocation2 + $0x50] sm:$0xff]  ;;  %v313_v34 = vld [vmem:[#allocation2 + $0x58] sm:$0xff] }
  0x26   : > { %1001 = vmatpush3.bf16.msra.mxu0 %v291_v39  ;;  %1067 = vmatpush3.bf16.msra.mxu1 %v291_v39 }
  0x27   : > { %1002 = vmatprep.subr.bf16.mxu0 %v300_v40  ;;  %1060 = vmatprep.subr.bf16.mxu1 %v300_v40 }
  0x2a   : > { %1003 = vmatpush3.bf16.msra.mxu0 %v292_v45  ;;  %1068 = vmatpush3.bf16.msra.mxu1 %v292_v45 }
  0x2b   : > { %1004 = vmatprep.subr.bf16.mxu0 %v301_v46  ;;  %1061 = vmatprep.subr.bf16.mxu1 %v301_v46  ;;  %v306_v46 = vld [vmem:[#allocation2 + $0x20] sm:$0xff] }
  0x2e   : > { %1005 = vmatpush3.bf16.msra.mxu0 %v293_v49  ;;  %1069 = vmatpush3.bf16.msra.mxu1 %v293_v49  ;;  %v314_v49 = vld [vmem:[#allocation2 + $0x60] sm:$0xff] }
  0x31   : > { %447 = vmatmul.mubr.bf16.vlgmr.msra.gmra.mrb[0].mxu0 %v1131_v50  ;;  %479 = vmatmul.mubr.bf16.vlgmr.msra.gmra.mrb[0].mxu1 %v1134_v51 }
  0x32   : > { %454 = vmatprep.mubr.bf16.mxu0 %v1137_v52  ;;  %486 = vmatprep.mubr.bf16.mxu1 %v1140_v53 }
  0x39   : > { %455 = vmatmul.mubr.bf16.gmra.mrb[4].mxu0 %v1139_v54  ;;  %487 = vmatmul.mubr.bf16.gmra.mrb[4].mxu1 %v1142_v55  ;;  %v307_v55 = vld [vmem:[#allocation2 + $0x28] sm:$0xff] }
  0x3a   : > { %462 = vmatprep.mubr.bf16.mxu0 %v1143_v56  ;;  %494 = vmatprep.mubr.bf16.mxu1 %v1146_v57  ;;  %v315_v57 = vld [vmem:[#allocation2 + $0x68] sm:$0xff] }
  0x41   : > { %463 = vmatmul.mubr.bf16.gmra.mrb[8].mxu0 %v1145_v58  ;;  %495 = vmatmul.mubr.bf16.gmra.mrb[8].mxu1 %v1148_v59 }
  0x42   : > { %470 = vmatprep.mubr.bf16.mxu0 %v1149_v60  ;;  %502 = vmatprep.mubr.bf16.mxu1 %v1152_v61 }
  0x49   : > { %471 = vmatmul.mubr.bf16.gmra.mrb[12].mxu0 %v1151_v62  ;;  %503 = vmatmul.mubr.bf16.gmra.mrb[12].mxu1 %v1154_v63 }
 0x104   : > { %v1006_v2 = vpop.f32.mrb[0].mxu0  ;;  %v1030_v3 = vpop.f32.mrb[0].mxu1 }
 0x105   : > { %v1007_v5 = vpop.f32.mrb[1].mxu0  ;;  %v1031_v7 = vpop.f32.mrb[1].mxu1 }
 0x106   : > { %v1008_v8 = vadd.f32 %v1007_v5, %v1006_v2  ;;  %v1032_v9 = vadd.f32 %v1031_v7, %v1030_v3  ;;  %v1009_v10 = vpop.f32.mrb[2].mxu0  ;;  %v1033_v11 = vpop.f32.mrb[2].mxu1 }
 0x107   : > { %v1010_v13 = vpop.f32.mrb[3].mxu0  ;;  %v1034_v15 = vpop.f32.mrb[3].mxu1 }
 0x108   : > { %v511_v16 = vadd.f32 %v1008_v8, %v302_v4  ;;  %v519_v17 = vadd.f32 %v1032_v9, %v310_v6  ;;  %v1011_v18 = vadd.f32 %v1010_v13, %v1009_v10  ;;  %v1035_v19 = vadd.f32 %v1034_v15, %v1033_v11  ;;  %v308_v6 = vld [vmem:[#allocation2 + $0x30] sm:$0xff]  ;;  %v309_v15 = vld [vmem:[#allocation2 + $0x38] sm:$0xff] }
 0x109   : > { %v316_v9 = vld [vmem:[#allocation2 + $0x70] sm:$0xff] }
 0x10a   : > { %528 = vst.msk [vmem:[#allocation2] sm:$0xff] %vm235_vm0, %v511_v16  ;;  %536 = vst.msk [vmem:[#allocation2 + $0x40] sm:$0xff] %vm235_vm0, %v519_v17  ;;  %v512_v20 = vadd.f32 %v1011_v18, %v303_v12  ;;  %v520_v21 = vadd.f32 %v1035_v19, %v311_v14  ;;  %v317_v17 = vld [vmem:[#allocation2 + $0x78] sm:$0xff] }
 0x10c   : > { %529 = vst.msk [vmem:[#allocation2 + $0x8] sm:$0xff] %vm235_vm0, %v512_v20  ;;  %537 = vst.msk [vmem:[#allocation2 + $0x48] sm:$0xff] %vm235_vm0, %v520_v21  ;;  %v1012_v22 = vpop.f32.mrb[4].mxu0  ;;  %v1036_v23 = vpop.f32.mrb[4].mxu1 }
 0x10d   : > { %v1013_v25 = vpop.f32.mrb[5].mxu0  ;;  %v1037_v27 = vpop.f32.mrb[5].mxu1 }
 0x10e   : > { %v1014_v28 = vadd.f32 %v1013_v25, %v1012_v22  ;;  %v1015_v29 = vpop.f32.mrb[6].mxu0  ;;  %v1038_v30 = vadd.f32 %v1037_v27, %v1036_v23  ;;  %v1039_v31 = vpop.f32.mrb[6].mxu1 }
 0x10f   : > { %v1016_v33 = vpop.f32.mrb[7].mxu0  ;;  %v1040_v35 = vpop.f32.mrb[7].mxu1 }
 0x110   : > { %v513_v36 = vadd.f32 %v1014_v28, %v304_v24  ;;  %v1017_v37 = vadd.f32 %v1016_v33, %v1015_v29  ;;  %v521_v38 = vadd.f32 %v1038_v30, %v312_v26  ;;  %v1041_v39 = vadd.f32 %v1040_v35, %v1039_v31  ;;  %v1473_v35 = vld [vmem:[%s1584_s2] ss:$0 sm:$0xff] }
 0x111   : > { %v547_v40 = vld [vmem:[#allocation2] sm:$0xff] }
 0x112   : > { %530 = vst.msk [vmem:[#allocation2 + $0x10] sm:$0xff] %vm235_vm0, %v513_v36  ;;  %v514_v41 = vadd.f32 %v1017_v37, %v305_v32  ;;  %538 = vst.msk [vmem:[#allocation2 + $0x50] sm:$0xff] %vm235_vm0, %v521_v38  ;;  %v522_v42 = vadd.f32 %v1041_v39, %v313_v34  ;;  %566 = vperm.xlu0 %1129, %v547_v40   ;;  %v555_v48 = vld [vmem:[#allocation2 + $0x40] sm:$0xff] }
 0x113   : > { %v556_v43 = vld [vmem:[#allocation2 + $0x48] sm:$0xff]  ;;  %v1479_v38 = vld [vmem:[%s1585_s3] ss:$0 sm:$0xff] }
 0x114   : > { %531 = vst.msk [vmem:[#allocation2 + $0x18] sm:$0xff] %vm235_vm0, %v514_v41  ;;  %539 = vst.msk [vmem:[#allocation2 + $0x58] sm:$0xff] %vm235_vm0, %v522_v42  ;;  %611 = vperm.xlu1 %1130, %v556_v43   ;;  %v1018_v44 = vpop.f32.mrb[8].mxu0  ;;  %v1042_v45 = vpop.f32.mrb[8].mxu1  ;;  %v548_v0 = vld [vmem:[#allocation2 + $0x8] sm:$0xff] }
 0x115   : > { %v1019_v47 = vpop.f32.mrb[9].mxu0  ;;  %v1043_v50 = vpop.f32.mrb[9].mxu1 }
 0x116   : > { %v1020_v51 = vadd.f32 %v1019_v47, %v1018_v44  ;;  %v1021_v52 = vpop.f32.mrb[10].mxu0  ;;  %606 = vperm.xlu0 %1129, %v555_v48   ;;  %v1044_v53 = vadd.f32 %v1043_v50, %v1042_v45  ;;  %v1045_v54 = vpop.f32.mrb[10].mxu1 }
 0x117   : > { %v1022_v56 = vpop.f32.mrb[11].mxu0  ;;  %v1046_v58 = vpop.f32.mrb[11].mxu1 }
 0x118   : > { %v515_v59 = vadd.f32 %v1020_v51, %v306_v46  ;;  %v1023_v60 = vadd.f32 %v1022_v56, %v1021_v52  ;;  %v523_v61 = vadd.f32 %v1044_v53, %v314_v49  ;;  %v1047_v62 = vadd.f32 %v1046_v58, %v1045_v54 }
 0x119   : > { %v549_v63 = vld [vmem:[#allocation2 + $0x10] sm:$0xff] }
 0x11a   : > { %532 = vst.msk [vmem:[#allocation2 + $0x20] sm:$0xff] %vm235_vm0, %v515_v59  ;;  %v516_v1 = vadd.f32 %v1023_v60, %v307_v55  ;;  %540 = vst.msk [vmem:[#allocation2 + $0x60] sm:$0xff] %vm235_vm0, %v523_v61  ;;  %v524_v2 = vadd.f32 %v1047_v62, %v315_v57  ;;  %576 = vperm.xlu1 %1130, %v549_v63   ;;  %571 = vperm.xlu0 %1129, %v548_v0   ;;  %v557_v3 = vld [vmem:[#allocation2 + $0x50] sm:$0xff] }
 0x11b   : > { %v550_v8 = vld [vmem:[#allocation2 + $0x18] sm:$0xff] }
 0x11c   : > { %533 = vst.msk [vmem:[#allocation2 + $0x28] sm:$0xff] %vm235_vm0, %v516_v1  ;;  %541 = vst.msk [vmem:[#allocation2 + $0x68] sm:$0xff] %vm235_vm0, %v524_v2  ;;  %v1024_v4 = vpop.f32.mrb[12].mxu0  ;;  %v1048_v5 = vpop.f32.mrb[12].mxu1  ;;  %v558_v23 = vld [vmem:[#allocation2 + $0x58] sm:$0xff] }
 0x11d   : > { %v1025_v7 = vpop.f32.mrb[13].mxu0  ;;  %v1049_v10 = vpop.f32.mrb[13].mxu1 }
 0x11e   : > { %v1026_v11 = vadd.f32 %v1025_v7, %v1024_v4  ;;  %v1027_v12 = vpop.f32.mrb[14].mxu0  ;;  %581 = vperm.xlu1 %1130, %v550_v8   ;;  %616 = vperm.xlu0 %1129, %v557_v3   ;;  %v1050_v13 = vadd.f32 %v1049_v10, %v1048_v5  ;;  %v1051_v14 = vpop.f32.mrb[14].mxu1 }
 0x11f   : > { %v1028_v16 = vpop.f32.mrb[15].mxu0  ;;  %v1052_v18 = vpop.f32.mrb[15].mxu1 }
 0x120   : > { %v517_v19 = vadd.f32 %v1026_v11, %v308_v6  ;;  %v1029_v20 = vadd.f32 %v1028_v16, %v1027_v12  ;;  %v525_v21 = vadd.f32 %v1050_v13, %v316_v9  ;;  %v1053_v22 = vadd.f32 %v1052_v18, %v1051_v14 }
 0x121   : > { %v551_v24 = vld [vmem:[#allocation2 + $0x20] sm:$0xff] }
 0x122   : > { %534 = vst.msk [vmem:[#allocation2 + $0x30] sm:$0xff] %vm235_vm0, %v517_v19  ;;  %v518_v25 = vadd.f32 %v1029_v20, %v309_v15  ;;  %542 = vst.msk [vmem:[#allocation2 + $0x70] sm:$0xff] %vm235_vm0, %v525_v21  ;;  %v526_v26 = vadd.f32 %v1053_v22, %v317_v17  ;;  %621 = vperm.xlu1 %1130, %v558_v23   ;;  %586 = vperm.xlu0 %1129, %v551_v24   ;;  %v559_v27 = vld [vmem:[#allocation2 + $0x60] sm:$0xff] }
 0x123   : > { %v552_v28 = vld [vmem:[#allocation2 + $0x28] sm:$0xff] }
 0x124   : > { %535 = vst.msk [vmem:[#allocation2 + $0x38] sm:$0xff] %vm235_vm0, %v518_v25  ;;  %543 = vst.msk [vmem:[#allocation2 + $0x78] sm:$0xff] %vm235_vm0, %v526_v26  ;;  %v560_v29 = vld [vmem:[#allocation2 + $0x68] sm:$0xff] }
 0x126   : > { %591 = vperm.xlu1 %1130, %v552_v28   ;;  %626 = vperm.xlu0 %1129, %v559_v27  }
 0x129   : > { %v553_v30 = vld [vmem:[#allocation2 + $0x30] sm:$0xff] }
 0x12a   : > { %631 = vperm.xlu1 %1130, %v560_v29   ;;  %596 = vperm.xlu0 %1129, %v553_v30   ;;  %v561_v31 = vld [vmem:[#allocation2 + $0x70] sm:$0xff] }
 0x12b   : > { %v554_v32 = vld [vmem:[#allocation2 + $0x38] sm:$0xff] }
 0x12c   : > { %v562_v33 = vld [vmem:[#allocation2 + $0x78] sm:$0xff] }
 0x12e   : > { %601 = vperm.xlu1 %1130, %v554_v32   ;;  %636 = vperm.xlu0 %1129, %v561_v31  }
 0x132   : > { %641 = vperm.xlu1 %1130, %v562_v33  }
 0x191   : > { %v567_v34 = vpop.permute.xlu0 %566 }
 0x192   : > { %v650_v39 = vmul.f32 %v1473_v35, %v567_v34 }
 0x193   : > { %v612_v36 = vpop.permute.xlu1 %611 }
 0x194   : > { %v659_v37 = vmul.f32 %v1473_v35, %v612_v36  ;;  %v673_v44 = vadd.f32 %v1479_v38, %v650_v39 }
 0x195   : > { %v607_v40 = vpop.permute.xlu0 %606 }
 0x196   : > { %v682_v41 = vadd.f32 %v1479_v38, %v659_v37  ;;  %v658_v42 = vmul.f32 %v1473_v35, %v607_v40  ;;  %v689_v53 = vmax.f32 %v673_v44, 0.0 }
 0x198   : > { %v681_v43 = vadd.f32 %v1479_v38, %v658_v42  ;;  %v698_v47 = vmax.f32 %v682_v41, 0.0 }
 0x199   : > { %v577_v45 = vpop.permute.xlu1 %576  ;;  %v572_v46 = vpop.permute.xlu0 %571 }
 0x19a   : > { %v697_v48 = vmax.f32 %v681_v43, 0.0  ;;  %v652_v49 = vmul.f32 %v1473_v35, %v577_v45  ;;  %v651_v50 = vmul.f32 %v1473_v35, %v572_v46 }
 0x19c   : > { %v966_v51 = vpack.c.bf16 %v698_v47, %v697_v48  ;;  %v674_v52 = vadd.f32 %v1479_v38, %v651_v50  ;;  %v675_v56 = vadd.f32 %v1479_v38, %v652_v49 }
 0x19d   : > { %v582_v54 = vpop.permute.xlu1 %581  ;;  %v617_v55 = vpop.permute.xlu0 %616 }
 0x19e   : > { %986 = vst [vmem:[%s1492_s22 + $0x20] sm:$0xff] %v966_v51   ;;  %v690_v57 = vmax.f32 %v674_v52, 0.0  ;;  %v653_v58 = vmul.f32 %v1473_v35, %v582_v54  ;;  %v660_v59 = vmul.f32 %v1473_v35, %v617_v55  ;;  %v691_v1 = vmax.f32 %v675_v56, 0.0 }
 0x1a0   : > { %v946_v60 = vpack.c.bf16 %v690_v57, %v689_v53  ;;  %v676_v61 = vadd.f32 %v1479_v38, %v653_v58  ;;  %v683_v62 = vadd.f32 %v1479_v38, %v660_v59 }
 0x1a1   : > { %v622_v63 = vpop.permute.xlu1 %621  ;;  %v587_v0 = vpop.permute.xlu0 %586 }
 0x1a2   : > { %947 = vst [vmem:[%s1492_s22] sm:$0xff] %v946_v60   ;;  %v692_v2 = vmax.f32 %v676_v61, 0.0  ;;  %v661_v3 = vmul.f32 %v1473_v35, %v622_v63  ;;  %v654_v4 = vmul.f32 %v1473_v35, %v587_v0  ;;  %v699_v7 = vmax.f32 %v683_v62, 0.0 }
 0x1a4   : > { %v951_v5 = vpack.c.bf16 %v692_v2, %v691_v1  ;;  %v684_v6 = vadd.f32 %v1479_v38, %v661_v3  ;;  %v677_v11 = vadd.f32 %v1479_v38, %v654_v4 }
 0x1a5   : > { %v592_v8 = vpop.permute.xlu1 %591  ;;  %v627_v9 = vpop.permute.xlu0 %626 }
 0x1a6   : > { %983 = vst [vmem:[%s1492_s22 + $0x8] sm:$0xff] %v951_v5   ;;  %v700_v10 = vmax.f32 %v684_v6, 0.0  ;;  %v655_v12 = vmul.f32 %v1473_v35, %v592_v8  ;;  %v662_v13 = vmul.f32 %v1473_v35, %v627_v9  ;;  %v693_v19 = vmax.f32 %v677_v11, 0.0 }
 0x1a8   : > { %v971_v14 = vpack.c.bf16 %v700_v10, %v699_v7  ;;  %v678_v15 = vadd.f32 %v1479_v38, %v655_v12  ;;  %v685_v16 = vadd.f32 %v1479_v38, %v662_v13 }
 0x1a9   : > { %v632_v17 = vpop.permute.xlu1 %631  ;;  %v597_v18 = vpop.permute.xlu0 %596 }
 0x1aa   : > { %987 = vst [vmem:[%s1492_s22 + $0x28] sm:$0xff] %v971_v14   ;;  %v694_v20 = vmax.f32 %v678_v15, 0.0  ;;  %v663_v21 = vmul.f32 %v1473_v35, %v632_v17  ;;  %v656_v22 = vmul.f32 %v1473_v35, %v597_v18  ;;  %v701_v25 = vmax.f32 %v685_v16, 0.0 }
 0x1ac   : > { %v956_v23 = vpack.c.bf16 %v694_v20, %v693_v19  ;;  %v686_v24 = vadd.f32 %v1479_v38, %v663_v21  ;;  %v679_v29 = vadd.f32 %v1479_v38, %v656_v22 }
 0x1ad   : > { %v602_v26 = vpop.permute.xlu1 %601  ;;  %v637_v27 = vpop.permute.xlu0 %636 }
 0x1ae   : > { %984 = vst [vmem:[%s1492_s22 + $0x10] sm:$0xff] %v956_v23   ;;  %v702_v28 = vmax.f32 %v686_v24, 0.0  ;;  %v657_v30 = vmul.f32 %v1473_v35, %v602_v26  ;;  %v664_v31 = vmul.f32 %v1473_v35, %v637_v27  ;;  %v695_v36 = vmax.f32 %v679_v29, 0.0 }
 0x1b0   : > { %v976_v32 = vpack.c.bf16 %v702_v28, %v701_v25  ;;  %v680_v33 = vadd.f32 %v1479_v38, %v657_v30  ;;  %v687_v39 = vadd.f32 %v1479_v38, %v664_v31 }
 0x1b1   : > { %v642_v34 = vpop.permute.xlu1 %641 }
 0x1b2   : > { %988 = vst [vmem:[%s1492_s22 + $0x30] sm:$0xff] %v976_v32   ;;  %v696_v37 = vmax.f32 %v680_v33, 0.0  ;;  %v665_v40 = vmul.f32 %v1473_v35, %v642_v34  ;;  %v703_v43 = vmax.f32 %v687_v39, 0.0 }
 0x1b4   : > { %v961_v41 = vpack.c.bf16 %v696_v37, %v695_v36  ;;  %v688_v42 = vadd.f32 %v1479_v38, %v665_v40 }
 0x1b6   : > { %985 = vst [vmem:[%s1492_s22 + $0x18] sm:$0xff] %v961_v41   ;;  %v704_v44 = vmax.f32 %v688_v42, 0.0 }
 0x1b8   : > { %v981_v45 = vpack.c.bf16 %v704_v44, %v703_v43 }
 0x1ba   : > { %989 = vst [vmem:[%s1492_s22 + $0x38] sm:$0xff] %v981_v45  }
 0x1bb   : > { %1168 = shalt.err (!%p1165_p5)
}
 0x1bc   : > { %s1169_s30 = scalar_lea.hbm %s1529_s5, 1024  ;;  %s1173_s13 = scalar_lea.hbm %s1586_s4, 2048 }
 0x1bd   : > { %p1170_p6 = scmp.ne.s32.totalorder %s1529_s5, %s1169_s30  ;;  %p1174_p10 = scmp.lt.u32.totalorder %s1529_s5, %s1586_s4 }
 0x1be   : > { %p1175_p11 = scmp.lt.u32.totalorder %s1173_s13, %s1169_s30  ;;  %p1177_p13 = scmp.lt.u32.totalorder %s1169_s30, %s1529_s5 }
 0x1bf   : > { %p1171_p7 = pnand %p1170_p6, %p1305_p4 }
 0x1c0   : > { %p1176_p12 = por %p1175_p11, %p1174_p10 }
 0x1c1   : > { %p1172_p9 = pneg %p1171_p7 }
 0x1c2   : > { %p1178_p0 = por %p1177_p13, %p1176_p12 }
 0x1c4   : > { %p1179_p1 = pnand %p1178_p0, %p1172_p9 }
 0x1c6   : > { %1182 = shalt.err (!%p1179_p1)
}
 0x1c7   : > { %s1238_s22 = smov 64   ;;  %s1239_s24 = smov 4  }
 0x1c8   : > { %1070 = dma.vmem_to_hbm [thread:$0]  (%p1305_p4), %s1531_s26, 1024, %s1529_s5, %s1536_s6, %s1238_s22, %s1238_s22, %s1239_s24  }
 0x1c9 PF: > { %p1076_p2 = scmp.ge.s32.totalorder %s1233_s20, 2  ;;  %s814_s29 = sand.u32 1, %s1213_s15  }
 0x1ca   : > { %s815_s9 = scalar_lea.sflag [#allocation4], %s814_s29 }
 0x1cb   : > { %p1073_p3 = pnand %p1076_p2, %p1312_p8 }
 0x1cd   : > { %1208 = dma.done.wait (!%p1073_p3), %s815_s9, 1024  }
 0x1ce   : > { %1210 = vsyncadd (!%p1073_p3), %s815_s9, 4294966272  ;;  %s17_s20 = sadd.s32 1, %s1233_s20   ;;  %s1589_s15 = smov %s1217_s16 }
 0x1cf   : > { %p14_p5 = scmp.ge.s32.totalorder %s17_s20, 4   ;;  %s1590_s16 = smov %s1221_s17 }
 0x1d0   : > { %s1591_s17 = smov %s1318_s28  ;;  %s1592_s18 = smov %s1229_s19 }
 0x1d1   : > { %s1593_s19 = smov %s1595_s23  ;;  %16 = sbr.rel (!%p14_p5) target bundleno = 4 (0x4), region = 80 }
 0x1d8   :  { %820 = vsyncpa [#allocation4], 1 }
 0x1d9   :  { %822 = vsyncpa [#allocation4 + $0x1], 1 }

</bundles_post_ra>
